<compile_context>
chip_gen: v6e
topology: v6e:2x2x1
jax: 0.10.0
libtpu: 0.0.40
codegen_flags: <defaults>
</compile_context>

<pallas_src>
import jax
import jax.numpy as jnp
from jax.experimental import pallas as pl
from jax.experimental.pallas import tpu as pltpu

# ---------------- synthetic config (stands in for `opt`) ----------------
SECTIONS     = ("title", "abstract")          # opt.text_section
FILTER_SIZES = (2, 3)                         # opt.filter_size
NUM_FILTERS  = {"title": 4, "abstract": 4}    # opt.num_filters
SEQ_LENS     = {"title": 8, "abstract": 8}    # opt.seq_lens
VOCAB_SIZE   = 50                             # opt.vocab_size
INPUT_SIZE   = 16                             # INPUT_SIZE (embedding dim)
BATCH        = 2                              # opt.batch_size
HIDDEN_FC    = 8
OUTPUT_SIZE  = 2
TOTAL_FEATS  = len(FILTER_SIZES) * sum(NUM_FILTERS.values())   # fc1 in_features


# --------------------------- Pallas kernel -------------------------------
def make_cnn_kernel(sections, filter_sizes, num_filters, seq_lens, batch, emb_dim):
    n_sec  = len(sections)
    fs_min = min(filter_sizes)
    fs_max = max(filter_sizes)

    # static column offsets of each (section, filter_size) branch in the merged weight
    col_off = {}
    off = 0
    for sec in sections:
        for fs in filter_sizes:
            col_off[(sec, fs)] = off
            off += num_filters[sec]

    def kernel(*refs):
        ids_refs = refs[:n_sec]                                 # SMEM (S, B) int32 per section
        (emb_ref, wconv_ref, bconv_ref,
         w1_ref, b1_ref, w2_ref, b2_ref) = refs[n_sec:n_sec + 7]
        out_ref = refs[n_sec + 7]                               # (B, 2)

        n_zero = fs_max - fs_min
        zrow = jnp.zeros((n_zero, emb_dim), jnp.float32) if n_zero else None

        # ---- embedding gather + shared im2col (one block per (section, batch)) ----
        blocks = []          # (L_pad_sec, fs_max*E) each
        block_row_off = []
        row_cursor = 0
        for si, sec in enumerate(sections):
            S = seq_lens[sec]
            L_pad = S - fs_min + 1
            ids_ref = ids_refs[si]
            for b in range(batch):
                rows = [emb_ref[pl.ds(ids_ref[t, b], 1), :] for t in range(S)]
                if zrow is not None:
                    rows.append(zrow)
                x_pad = jnp.concatenate(rows, axis=0)           # (S + n_zero, E)
                win = jnp.concatenate(
                    [x_pad[dh:dh + L_pad, :] for dh in range(fs_max)],
                    axis=1)                                     # (L_pad, fs_max*E)
                blocks.append(win)
                block_row_off.append(row_cursor)
                row_cursor += L_pad
        im2col = jnp.concatenate(blocks, axis=0)                # (sum_rows, fs_max*E)

        # ---- single merged conv matmul covering all branches & batches ----
        scores = jnp.dot(im2col, wconv_ref[...],
                         preferred_element_type=jnp.float32)    # (sum_rows, TOTAL_FEATS)

        # ---- per-branch global max-pool over valid time positions (kept in vregs) ----
        feat_rows = []
        for b in range(batch):
            per_branch = []
            for si, sec in enumerate(sections):
                S = seq_lens[sec]
                L_pad = S - fs_min + 1
                r0 = block_row_off[si * batch + b]
                block = scores[r0:r0 + L_pad, :]                # (L_pad, TOTAL_FEATS)
                for fs in filter_sizes:
                    nf = num_filters[sec]
                    c0 = col_off[(sec, fs)]
                    L_valid = S - fs + 1
                    per_branch.append(
                        jnp.max(block[:L_valid, c0:c0 + nf], axis=0, keepdims=True))
            feat_rows.append(jnp.concatenate(per_branch, axis=1))   # (1, TOTAL_FEATS)
        feat = jnp.concatenate(feat_rows, axis=0)               # (B, TOTAL_FEATS)

        # bias + ReLU folded after the pool (exact: ReLU monotone, per-channel bias)
        feat = jnp.maximum(feat + bconv_ref[...], 0.0)

        # ---- MLP head: fc1 -> ReLU -> (dropout = identity) -> fc2 ----
        h = jnp.maximum(
            jnp.dot(feat, w1_ref[...], preferred_element_type=jnp.float32)
            + b1_ref[...], 0.0)
        out_ref[...] = (
            jnp.dot(h, w2_ref[...], preferred_element_type=jnp.float32)
            + b2_ref[...])

    return kernel


# ----------------------------- wrapper ------------------------------------
def cnn_forward(text, params):
    E = INPUT_SIZE
    fs_max = max(FILTER_SIZES)
    n_sec = len(SECTIONS)

    # Pack all conv weights into ONE merged matmul operand:
    #   rows  = dh*E + e  (zero-padded to fs_max*E for short filters)
    #   cols  = branch channels in PyTorch cat order (section-major, fs-minor)
    cols, bias_cols = [], []
    for sec in SECTIONS:
        for fi, fs in enumerate(FILTER_SIZES):
            w = params["conv_w"][sec][fi]                        # (nf, fs, E)
            nf = w.shape[0]
            w = jnp.transpose(w, (1, 2, 0)).reshape(fs * E, nf)  # (fs*E, nf)
            if fs < fs_max:
                w = jnp.concatenate(
                    [w, jnp.zeros(((fs_max - fs) * E, nf), jnp.float32)], axis=0)
            cols.append(w)
            bias_cols.append(params["conv_b"][sec][fi])
    w_conv = jnp.concatenate(cols, axis=1)                       # (fs_max*E, TOTAL_FEATS)
    b_conv = jnp.concatenate(bias_cols).reshape(1, -1)           # (1, TOTAL_FEATS)

    w1_t = params["w1"].T                   # (TOTAL_FEATS, 8)
    b1   = params["b1"].reshape(1, -1)
    w2_t = params["w2"].T                   # (8, 2)
    b2   = params["b2"].reshape(1, -1)

    ids = [text[sec].astype(jnp.int32) for sec in SECTIONS]      # (S, B) each, seq-first

    kernel = make_cnn_kernel(SECTIONS, FILTER_SIZES, NUM_FILTERS, SEQ_LENS, BATCH, E)

    inputs = [*ids, params["emb"].astype(jnp.float32),
              w_conv, b_conv, w1_t, b1, w2_t, b2]
    in_specs = (
        [pl.BlockSpec(memory_space=pltpu.MemorySpace.SMEM)] * n_sec
        + [pl.BlockSpec(memory_space=pltpu.MemorySpace.VMEM)] * (len(inputs) - n_sec)
    )
    return pl.pallas_call(
        kernel,
        out_shape=jax.ShapeDtypeStruct((BATCH, OUTPUT_SIZE), jnp.float32),
        in_specs=in_specs,
        out_specs=pl.BlockSpec(memory_space=pltpu.MemorySpace.VMEM),
    )(*inputs)


# ------------------------- pure-JAX reference ------------------------------
def cnn_reference(text, params):
    feats = []
    for sec in SECTIONS:
        e = jnp.take(params["emb"], text[sec], axis=0)     # (S, B, E)
        x = jnp.transpose(e, (1, 0, 2))                    # (B, S, E)
        for fi, fs in enumerate(FILTER_SIZES):
            w  = params["conv_w"][sec][fi]                 # (nf, fs, E)
            bb = params["conv_b"][sec][fi]
            L = SEQ_LENS[sec] - fs + 1
            cols = []
            for t in range(L):
                win = x[:, t:t + fs, :]                    # (B, fs, E)
                cols.append(jnp.einsum('bfe,nfe->bn', win, w) + bb)
            z = jnp.maximum(jnp.stack(cols, axis=1), 0.0)  # (B, L, nf)
            feats.append(jnp.max(z, axis=1))               # (B, nf)
    feat = jnp.concatenate(feats, axis=1)
    h = jnp.maximum(feat @ params["w1"].T + params["b1"], 0.0)
    return h @ params["w2"].T + params["b2"]


# -------------------------- parameter init ---------------------------------
def init_params(key):
    ks = jax.random.split(key, 16)
    params = {"emb": 0.1 * jax.random.normal(
        ks[0], (VOCAB_SIZE + 3, INPUT_SIZE), jnp.float32)}
    conv_w, conv_b = {}, {}
    i = 1
    for sec in SECTIONS:
        nf = NUM_FILTERS[sec]
        conv_w[sec], conv_b[sec] = [], []
        for fs in FILTER_SIZES:
            conv_w[sec].append(
                0.1 * jax.random.normal(ks[i], (nf, fs, INPUT_SIZE), jnp.float32))
            conv_b[sec].append(
                0.1 * jax.random.normal(ks[i + 1], (nf,), jnp.float32))
            i += 2
    params["conv_w"], params["conv_b"] = conv_w, conv_b
    params["w1"] = 0.1 * jax.random.normal(ks[i],     (HIDDEN_FC, TOTAL_FEATS), jnp.float32)
    params["b1"] = 0.1 * jax.random.normal(ks[i + 1], (HIDDEN_FC,), jnp.float32)
    params["w2"] = 0.1 * jax.random.normal(ks[i + 2], (OUTPUT_SIZE, HIDDEN_FC), jnp.float32)
    params["b2"] = 0.1 * jax.random.normal(ks[i + 3], (OUTPUT_SIZE,), jnp.float32)
    return params


if __name__ == "__main__":
    key = jax.random.PRNGKey(0)
    kp, kt = jax.random.split(key)
    params = init_params(kp)

    text = {}
    tks = jax.random.split(kt, len(SECTIONS))
    for i, sec in enumerate(SECTIONS):
        # text[section]: (seq_len, batch) int32 token ids (seq-first, as in PyTorch)
        text[sec] = jax.random.randint(
            tks[i], (SEQ_LENS[sec], BATCH), 0, VOCAB_SIZE + 3, dtype=jnp.int32)

    out = jax.block_until_ready(cnn_forward(text, params))
    ref = cnn_reference(text, params)

    assert out.shape == (BATCH, OUTPUT_SIZE)
    if not bool(jnp.allclose(out, ref, atol=1e-2, rtol=1e-2)):
        raise AssertionError(f"mismatch: pallas={out} ref={ref}")
    print("KERNEL_OK")
</pallas_src>

<mosaic_0001>
module attributes {stable_mosaic.version = 11 : i64} {
  func.func @kernel(%arg0: memref<8x2xi32, #tpu.memory_space<smem>>, %arg1: memref<8x2xi32, #tpu.memory_space<smem>>, %arg2: memref<53x16xf32, #tpu.memory_space<vmem>>, %arg3: memref<48x16xf32, #tpu.memory_space<vmem>>, %arg4: memref<1x16xf32, #tpu.memory_space<vmem>>, %arg5: memref<16x8xf32, #tpu.memory_space<vmem>>, %arg6: memref<1x8xf32, #tpu.memory_space<vmem>>, %arg7: memref<8x2xf32, #tpu.memory_space<vmem>>, %arg8: memref<1x2xf32, #tpu.memory_space<vmem>>, %arg9: memref<2x2xf32, #tpu.memory_space<vmem>>) attributes {dimension_semantics = [], scalar_prefetch = 0 : i64, scratch_operands = 0 : i64, tpu.core_type = #tpu.core_type<tc>} {
    %cst = arith.constant 0.000000e+00 : f32
    %0 = vector.broadcast %cst : f32 to vector<1x16xf32>
    %c0 = arith.constant 0 : index
    %c0_0 = arith.constant 0 : index
    %1 = memref.load %arg0[%c0, %c0_0] : memref<8x2xi32, #tpu.memory_space<smem>>
    %2 = arith.index_cast %1 : i32 to index
    %c0_1 = arith.constant 0 : index
    %3 = vector.load %arg2[%2, %c0_1] : memref<53x16xf32, #tpu.memory_space<vmem>>, vector<1x16xf32>
    %c1 = arith.constant 1 : index
    %c0_2 = arith.constant 0 : index
    %4 = memref.load %arg0[%c1, %c0_2] : memref<8x2xi32, #tpu.memory_space<smem>>
    %5 = arith.index_cast %4 : i32 to index
    %c0_3 = arith.constant 0 : index
    %6 = vector.load %arg2[%5, %c0_3] : memref<53x16xf32, #tpu.memory_space<vmem>>, vector<1x16xf32>
    %c2 = arith.constant 2 : index
    %c0_4 = arith.constant 0 : index
    %7 = memref.load %arg0[%c2, %c0_4] : memref<8x2xi32, #tpu.memory_space<smem>>
    %8 = arith.index_cast %7 : i32 to index
    %c0_5 = arith.constant 0 : index
    %9 = vector.load %arg2[%8, %c0_5] : memref<53x16xf32, #tpu.memory_space<vmem>>, vector<1x16xf32>
    %c3 = arith.constant 3 : index
    %c0_6 = arith.constant 0 : index
    %10 = memref.load %arg0[%c3, %c0_6] : memref<8x2xi32, #tpu.memory_space<smem>>
    %11 = arith.index_cast %10 : i32 to index
    %c0_7 = arith.constant 0 : index
    %12 = vector.load %arg2[%11, %c0_7] : memref<53x16xf32, #tpu.memory_space<vmem>>, vector<1x16xf32>
    %c4 = arith.constant 4 : index
    %c0_8 = arith.constant 0 : index
    %13 = memref.load %arg0[%c4, %c0_8] : memref<8x2xi32, #tpu.memory_space<smem>>
    %14 = arith.index_cast %13 : i32 to index
    %c0_9 = arith.constant 0 : index
    %15 = vector.load %arg2[%14, %c0_9] : memref<53x16xf32, #tpu.memory_space<vmem>>, vector<1x16xf32>
    %c5 = arith.constant 5 : index
    %c0_10 = arith.constant 0 : index
    %16 = memref.load %arg0[%c5, %c0_10] : memref<8x2xi32, #tpu.memory_space<smem>>
    %17 = arith.index_cast %16 : i32 to index
    %c0_11 = arith.constant 0 : index
    %18 = vector.load %arg2[%17, %c0_11] : memref<53x16xf32, #tpu.memory_space<vmem>>, vector<1x16xf32>
    %c6 = arith.constant 6 : index
    %c0_12 = arith.constant 0 : index
    %19 = memref.load %arg0[%c6, %c0_12] : memref<8x2xi32, #tpu.memory_space<smem>>
    %20 = arith.index_cast %19 : i32 to index
    %c0_13 = arith.constant 0 : index
    %21 = vector.load %arg2[%20, %c0_13] : memref<53x16xf32, #tpu.memory_space<vmem>>, vector<1x16xf32>
    %c7 = arith.constant 7 : index
    %c0_14 = arith.constant 0 : index
    %22 = memref.load %arg0[%c7, %c0_14] : memref<8x2xi32, #tpu.memory_space<smem>>
    %23 = arith.index_cast %22 : i32 to index
    %c0_15 = arith.constant 0 : index
    %24 = vector.load %arg2[%23, %c0_15] : memref<53x16xf32, #tpu.memory_space<vmem>>, vector<1x16xf32>
    %25 = tpu.concatenate %3, %6, %9, %12, %15, %18, %21, %24, %0 in 0 : vector<1x16xf32>, vector<1x16xf32>, vector<1x16xf32>, vector<1x16xf32>, vector<1x16xf32>, vector<1x16xf32>, vector<1x16xf32>, vector<1x16xf32>, vector<1x16xf32> -> vector<9x16xf32>
    %26 = vector.extract_strided_slice %25 {offsets = [0, 0], sizes = [7, 16], strides = [1, 1]} : vector<9x16xf32> to vector<7x16xf32>
    %27 = vector.extract_strided_slice %25 {offsets = [1, 0], sizes = [7, 16], strides = [1, 1]} : vector<9x16xf32> to vector<7x16xf32>
    %28 = vector.extract_strided_slice %25 {offsets = [2, 0], sizes = [7, 16], strides = [1, 1]} : vector<9x16xf32> to vector<7x16xf32>
    %29 = tpu.concatenate %26, %27, %28 in 1 : vector<7x16xf32>, vector<7x16xf32>, vector<7x16xf32> -> vector<7x48xf32>
    %c0_16 = arith.constant 0 : index
    %c1_17 = arith.constant 1 : index
    %30 = memref.load %arg0[%c0_16, %c1_17] : memref<8x2xi32, #tpu.memory_space<smem>>
    %31 = arith.index_cast %30 : i32 to index
    %c0_18 = arith.constant 0 : index
    %32 = vector.load %arg2[%31, %c0_18] : memref<53x16xf32, #tpu.memory_space<vmem>>, vector<1x16xf32>
    %c1_19 = arith.constant 1 : index
    %c1_20 = arith.constant 1 : index
    %33 = memref.load %arg0[%c1_19, %c1_20] : memref<8x2xi32, #tpu.memory_space<smem>>
    %34 = arith.index_cast %33 : i32 to index
    %c0_21 = arith.constant 0 : index
    %35 = vector.load %arg2[%34, %c0_21] : memref<53x16xf32, #tpu.memory_space<vmem>>, vector<1x16xf32>
    %c2_22 = arith.constant 2 : index
    %c1_23 = arith.constant 1 : index
    %36 = memref.load %arg0[%c2_22, %c1_23] : memref<8x2xi32, #tpu.memory_space<smem>>
    %37 = arith.index_cast %36 : i32 to index
    %c0_24 = arith.constant 0 : index
    %38 = vector.load %arg2[%37, %c0_24] : memref<53x16xf32, #tpu.memory_space<vmem>>, vector<1x16xf32>
    %c3_25 = arith.constant 3 : index
    %c1_26 = arith.constant 1 : index
    %39 = memref.load %arg0[%c3_25, %c1_26] : memref<8x2xi32, #tpu.memory_space<smem>>
    %40 = arith.index_cast %39 : i32 to index
    %c0_27 = arith.constant 0 : index
    %41 = vector.load %arg2[%40, %c0_27] : memref<53x16xf32, #tpu.memory_space<vmem>>, vector<1x16xf32>
    %c4_28 = arith.constant 4 : index
    %c1_29 = arith.constant 1 : index
    %42 = memref.load %arg0[%c4_28, %c1_29] : memref<8x2xi32, #tpu.memory_space<smem>>
    %43 = arith.index_cast %42 : i32 to index
    %c0_30 = arith.constant 0 : index
    %44 = vector.load %arg2[%43, %c0_30] : memref<53x16xf32, #tpu.memory_space<vmem>>, vector<1x16xf32>
    %c5_31 = arith.constant 5 : index
    %c1_32 = arith.constant 1 : index
    %45 = memref.load %arg0[%c5_31, %c1_32] : memref<8x2xi32, #tpu.memory_space<smem>>
    %46 = arith.index_cast %45 : i32 to index
    %c0_33 = arith.constant 0 : index
    %47 = vector.load %arg2[%46, %c0_33] : memref<53x16xf32, #tpu.memory_space<vmem>>, vector<1x16xf32>
    %c6_34 = arith.constant 6 : index
    %c1_35 = arith.constant 1 : index
    %48 = memref.load %arg0[%c6_34, %c1_35] : memref<8x2xi32, #tpu.memory_space<smem>>
    %49 = arith.index_cast %48 : i32 to index
    %c0_36 = arith.constant 0 : index
    %50 = vector.load %arg2[%49, %c0_36] : memref<53x16xf32, #tpu.memory_space<vmem>>, vector<1x16xf32>
    %c7_37 = arith.constant 7 : index
    %c1_38 = arith.constant 1 : index
    %51 = memref.load %arg0[%c7_37, %c1_38] : memref<8x2xi32, #tpu.memory_space<smem>>
    %52 = arith.index_cast %51 : i32 to index
    %c0_39 = arith.constant 0 : index
    %53 = vector.load %arg2[%52, %c0_39] : memref<53x16xf32, #tpu.memory_space<vmem>>, vector<1x16xf32>
    %54 = tpu.concatenate %32, %35, %38, %41, %44, %47, %50, %53, %0 in 0 : vector<1x16xf32>, vector<1x16xf32>, vector<1x16xf32>, vector<1x16xf32>, vector<1x16xf32>, vector<1x16xf32>, vector<1x16xf32>, vector<1x16xf32>, vector<1x16xf32> -> vector<9x16xf32>
    %55 = vector.extract_strided_slice %54 {offsets = [0, 0], sizes = [7, 16], strides = [1, 1]} : vector<9x16xf32> to vector<7x16xf32>
    %56 = vector.extract_strided_slice %54 {offsets = [1, 0], sizes = [7, 16], strides = [1, 1]} : vector<9x16xf32> to vector<7x16xf32>
    %57 = vector.extract_strided_slice %54 {offsets = [2, 0], sizes = [7, 16], strides = [1, 1]} : vector<9x16xf32> to vector<7x16xf32>
    %58 = tpu.concatenate %55, %56, %57 in 1 : vector<7x16xf32>, vector<7x16xf32>, vector<7x16xf32> -> vector<7x48xf32>
    %c0_40 = arith.constant 0 : index
    %c0_41 = arith.constant 0 : index
    %59 = memref.load %arg1[%c0_40, %c0_41] : memref<8x2xi32, #tpu.memory_space<smem>>
    %60 = arith.index_cast %59 : i32 to index
    %c0_42 = arith.constant 0 : index
    %61 = vector.load %arg2[%60, %c0_42] : memref<53x16xf32, #tpu.memory_space<vmem>>, vector<1x16xf32>
    %c1_43 = arith.constant 1 : index
    %c0_44 = arith.constant 0 : index
    %62 = memref.load %arg1[%c1_43, %c0_44] : memref<8x2xi32, #tpu.memory_space<smem>>
    %63 = arith.index_cast %62 : i32 to index
    %c0_45 = arith.constant 0 : index
    %64 = vector.load %arg2[%63, %c0_45] : memref<53x16xf32, #tpu.memory_space<vmem>>, vector<1x16xf32>
    %c2_46 = arith.constant 2 : index
    %c0_47 = arith.constant 0 : index
    %65 = memref.load %arg1[%c2_46, %c0_47] : memref<8x2xi32, #tpu.memory_space<smem>>
    %66 = arith.index_cast %65 : i32 to index
    %c0_48 = arith.constant 0 : index
    %67 = vector.load %arg2[%66, %c0_48] : memref<53x16xf32, #tpu.memory_space<vmem>>, vector<1x16xf32>
    %c3_49 = arith.constant 3 : index
    %c0_50 = arith.constant 0 : index
    %68 = memref.load %arg1[%c3_49, %c0_50] : memref<8x2xi32, #tpu.memory_space<smem>>
    %69 = arith.index_cast %68 : i32 to index
    %c0_51 = arith.constant 0 : index
    %70 = vector.load %arg2[%69, %c0_51] : memref<53x16xf32, #tpu.memory_space<vmem>>, vector<1x16xf32>
    %c4_52 = arith.constant 4 : index
    %c0_53 = arith.constant 0 : index
    %71 = memref.load %arg1[%c4_52, %c0_53] : memref<8x2xi32, #tpu.memory_space<smem>>
    %72 = arith.index_cast %71 : i32 to index
    %c0_54 = arith.constant 0 : index
    %73 = vector.load %arg2[%72, %c0_54] : memref<53x16xf32, #tpu.memory_space<vmem>>, vector<1x16xf32>
    %c5_55 = arith.constant 5 : index
    %c0_56 = arith.constant 0 : index
    %74 = memref.load %arg1[%c5_55, %c0_56] : memref<8x2xi32, #tpu.memory_space<smem>>
    %75 = arith.index_cast %74 : i32 to index
    %c0_57 = arith.constant 0 : index
    %76 = vector.load %arg2[%75, %c0_57] : memref<53x16xf32, #tpu.memory_space<vmem>>, vector<1x16xf32>
    %c6_58 = arith.constant 6 : index
    %c0_59 = arith.constant 0 : index
    %77 = memref.load %arg1[%c6_58, %c0_59] : memref<8x2xi32, #tpu.memory_space<smem>>
    %78 = arith.index_cast %77 : i32 to index
    %c0_60 = arith.constant 0 : index
    %79 = vector.load %arg2[%78, %c0_60] : memref<53x16xf32, #tpu.memory_space<vmem>>, vector<1x16xf32>
    %c7_61 = arith.constant 7 : index
    %c0_62 = arith.constant 0 : index
    %80 = memref.load %arg1[%c7_61, %c0_62] : memref<8x2xi32, #tpu.memory_space<smem>>
    %81 = arith.index_cast %80 : i32 to index
    %c0_63 = arith.constant 0 : index
    %82 = vector.load %arg2[%81, %c0_63] : memref<53x16xf32, #tpu.memory_space<vmem>>, vector<1x16xf32>
    %83 = tpu.concatenate %61, %64, %67, %70, %73, %76, %79, %82, %0 in 0 : vector<1x16xf32>, vector<1x16xf32>, vector<1x16xf32>, vector<1x16xf32>, vector<1x16xf32>, vector<1x16xf32>, vector<1x16xf32>, vector<1x16xf32>, vector<1x16xf32> -> vector<9x16xf32>
    %84 = vector.extract_strided_slice %83 {offsets = [0, 0], sizes = [7, 16], strides = [1, 1]} : vector<9x16xf32> to vector<7x16xf32>
    %85 = vector.extract_strided_slice %83 {offsets = [1, 0], sizes = [7, 16], strides = [1, 1]} : vector<9x16xf32> to vector<7x16xf32>
    %86 = vector.extract_strided_slice %83 {offsets = [2, 0], sizes = [7, 16], strides = [1, 1]} : vector<9x16xf32> to vector<7x16xf32>
    %87 = tpu.concatenate %84, %85, %86 in 1 : vector<7x16xf32>, vector<7x16xf32>, vector<7x16xf32> -> vector<7x48xf32>
    %c0_64 = arith.constant 0 : index
    %c1_65 = arith.constant 1 : index
    %88 = memref.load %arg1[%c0_64, %c1_65] : memref<8x2xi32, #tpu.memory_space<smem>>
    %89 = arith.index_cast %88 : i32 to index
    %c0_66 = arith.constant 0 : index
    %90 = vector.load %arg2[%89, %c0_66] : memref<53x16xf32, #tpu.memory_space<vmem>>, vector<1x16xf32>
    %c1_67 = arith.constant 1 : index
    %c1_68 = arith.constant 1 : index
    %91 = memref.load %arg1[%c1_67, %c1_68] : memref<8x2xi32, #tpu.memory_space<smem>>
    %92 = arith.index_cast %91 : i32 to index
    %c0_69 = arith.constant 0 : index
    %93 = vector.load %arg2[%92, %c0_69] : memref<53x16xf32, #tpu.memory_space<vmem>>, vector<1x16xf32>
    %c2_70 = arith.constant 2 : index
    %c1_71 = arith.constant 1 : index
    %94 = memref.load %arg1[%c2_70, %c1_71] : memref<8x2xi32, #tpu.memory_space<smem>>
    %95 = arith.index_cast %94 : i32 to index
    %c0_72 = arith.constant 0 : index
    %96 = vector.load %arg2[%95, %c0_72] : memref<53x16xf32, #tpu.memory_space<vmem>>, vector<1x16xf32>
    %c3_73 = arith.constant 3 : index
    %c1_74 = arith.constant 1 : index
    %97 = memref.load %arg1[%c3_73, %c1_74] : memref<8x2xi32, #tpu.memory_space<smem>>
    %98 = arith.index_cast %97 : i32 to index
    %c0_75 = arith.constant 0 : index
    %99 = vector.load %arg2[%98, %c0_75] : memref<53x16xf32, #tpu.memory_space<vmem>>, vector<1x16xf32>
    %c4_76 = arith.constant 4 : index
    %c1_77 = arith.constant 1 : index
    %100 = memref.load %arg1[%c4_76, %c1_77] : memref<8x2xi32, #tpu.memory_space<smem>>
    %101 = arith.index_cast %100 : i32 to index
    %c0_78 = arith.constant 0 : index
    %102 = vector.load %arg2[%101, %c0_78] : memref<53x16xf32, #tpu.memory_space<vmem>>, vector<1x16xf32>
    %c5_79 = arith.constant 5 : index
    %c1_80 = arith.constant 1 : index
    %103 = memref.load %arg1[%c5_79, %c1_80] : memref<8x2xi32, #tpu.memory_space<smem>>
    %104 = arith.index_cast %103 : i32 to index
    %c0_81 = arith.constant 0 : index
    %105 = vector.load %arg2[%104, %c0_81] : memref<53x16xf32, #tpu.memory_space<vmem>>, vector<1x16xf32>
    %c6_82 = arith.constant 6 : index
    %c1_83 = arith.constant 1 : index
    %106 = memref.load %arg1[%c6_82, %c1_83] : memref<8x2xi32, #tpu.memory_space<smem>>
    %107 = arith.index_cast %106 : i32 to index
    %c0_84 = arith.constant 0 : index
    %108 = vector.load %arg2[%107, %c0_84] : memref<53x16xf32, #tpu.memory_space<vmem>>, vector<1x16xf32>
    %c7_85 = arith.constant 7 : index
    %c1_86 = arith.constant 1 : index
    %109 = memref.load %arg1[%c7_85, %c1_86] : memref<8x2xi32, #tpu.memory_space<smem>>
    %110 = arith.index_cast %109 : i32 to index
    %c0_87 = arith.constant 0 : index
    %111 = vector.load %arg2[%110, %c0_87] : memref<53x16xf32, #tpu.memory_space<vmem>>, vector<1x16xf32>
    %112 = tpu.concatenate %90, %93, %96, %99, %102, %105, %108, %111, %0 in 0 : vector<1x16xf32>, vector<1x16xf32>, vector<1x16xf32>, vector<1x16xf32>, vector<1x16xf32>, vector<1x16xf32>, vector<1x16xf32>, vector<1x16xf32>, vector<1x16xf32> -> vector<9x16xf32>
    %113 = vector.extract_strided_slice %112 {offsets = [0, 0], sizes = [7, 16], strides = [1, 1]} : vector<9x16xf32> to vector<7x16xf32>
    %114 = vector.extract_strided_slice %112 {offsets = [1, 0], sizes = [7, 16], strides = [1, 1]} : vector<9x16xf32> to vector<7x16xf32>
    %115 = vector.extract_strided_slice %112 {offsets = [2, 0], sizes = [7, 16], strides = [1, 1]} : vector<9x16xf32> to vector<7x16xf32>
    %116 = tpu.concatenate %113, %114, %115 in 1 : vector<7x16xf32>, vector<7x16xf32>, vector<7x16xf32> -> vector<7x48xf32>
    %117 = tpu.concatenate %29, %58, %87, %116 in 0 : vector<7x48xf32>, vector<7x48xf32>, vector<7x48xf32>, vector<7x48xf32> -> vector<28x48xf32>
    %c0_88 = arith.constant 0 : index
    %c0_89 = arith.constant 0 : index
    %118 = vector.load %arg3[%c0_88, %c0_89] : memref<48x16xf32, #tpu.memory_space<vmem>>, vector<48x16xf32>
    %cst_90 = arith.constant dense<0.000000e+00> : vector<28x16xf32>
    %119 = tpu.matmul %117, %118, %cst_90 {dimension_numbers = #tpu.dot_dimension_numbers<[1], [0], [0], [1], [0, 0, 1, 1], [], []>} : vector<28x48xf32>, vector<48x16xf32>, vector<28x16xf32> -> vector<28x16xf32>
    %120 = vector.extract_strided_slice %119 {offsets = [0, 0], sizes = [7, 16], strides = [1, 1]} : vector<28x16xf32> to vector<7x16xf32>
    %121 = vector.extract_strided_slice %120 {offsets = [0, 0], sizes = [7, 4], strides = [1, 1]} : vector<7x16xf32> to vector<7x4xf32>
    %cst_91 = arith.constant dense<0xFF800000> : vector<4xf32>
    %122 = vector.multi_reduction <maximumf>, %121, %cst_91 [0] : vector<7x4xf32> to vector<4xf32>
    %123 = vector.shape_cast %122 : vector<4xf32> to vector<1x4xf32>
    %124 = vector.extract_strided_slice %120 {offsets = [0, 4], sizes = [6, 4], strides = [1, 1]} : vector<7x16xf32> to vector<6x4xf32>
    %cst_92 = arith.constant dense<0xFF800000> : vector<4xf32>
    %125 = vector.multi_reduction <maximumf>, %124, %cst_92 [0] : vector<6x4xf32> to vector<4xf32>
    %126 = vector.shape_cast %125 : vector<4xf32> to vector<1x4xf32>
    %127 = vector.extract_strided_slice %119 {offsets = [14, 0], sizes = [7, 16], strides = [1, 1]} : vector<28x16xf32> to vector<7x16xf32>
    %128 = vector.extract_strided_slice %127 {offsets = [0, 8], sizes = [7, 4], strides = [1, 1]} : vector<7x16xf32> to vector<7x4xf32>
    %cst_93 = arith.constant dense<0xFF800000> : vector<4xf32>
    %129 = vector.multi_reduction <maximumf>, %128, %cst_93 [0] : vector<7x4xf32> to vector<4xf32>
    %130 = vector.shape_cast %129 : vector<4xf32> to vector<1x4xf32>
    %131 = vector.extract_strided_slice %127 {offsets = [0, 12], sizes = [6, 4], strides = [1, 1]} : vector<7x16xf32> to vector<6x4xf32>
    %cst_94 = arith.constant dense<0xFF800000> : vector<4xf32>
    %132 = vector.multi_reduction <maximumf>, %131, %cst_94 [0] : vector<6x4xf32> to vector<4xf32>
    %133 = vector.shape_cast %132 : vector<4xf32> to vector<1x4xf32>
    %134 = tpu.concatenate %123, %126, %130, %133 in 1 : vector<1x4xf32>, vector<1x4xf32>, vector<1x4xf32>, vector<1x4xf32> -> vector<1x16xf32>
    %135 = vector.extract_strided_slice %119 {offsets = [7, 0], sizes = [7, 16], strides = [1, 1]} : vector<28x16xf32> to vector<7x16xf32>
    %136 = vector.extract_strided_slice %135 {offsets = [0, 0], sizes = [7, 4], strides = [1, 1]} : vector<7x16xf32> to vector<7x4xf32>
    %cst_95 = arith.constant dense<0xFF800000> : vector<4xf32>
    %137 = vector.multi_reduction <maximumf>, %136, %cst_95 [0] : vector<7x4xf32> to vector<4xf32>
    %138 = vector.shape_cast %137 : vector<4xf32> to vector<1x4xf32>
    %139 = vector.extract_strided_slice %135 {offsets = [0, 4], sizes = [6, 4], strides = [1, 1]} : vector<7x16xf32> to vector<6x4xf32>
    %cst_96 = arith.constant dense<0xFF800000> : vector<4xf32>
    %140 = vector.multi_reduction <maximumf>, %139, %cst_96 [0] : vector<6x4xf32> to vector<4xf32>
    %141 = vector.shape_cast %140 : vector<4xf32> to vector<1x4xf32>
    %142 = vector.extract_strided_slice %119 {offsets = [21, 0], sizes = [7, 16], strides = [1, 1]} : vector<28x16xf32> to vector<7x16xf32>
    %143 = vector.extract_strided_slice %142 {offsets = [0, 8], sizes = [7, 4], strides = [1, 1]} : vector<7x16xf32> to vector<7x4xf32>
    %cst_97 = arith.constant dense<0xFF800000> : vector<4xf32>
    %144 = vector.multi_reduction <maximumf>, %143, %cst_97 [0] : vector<7x4xf32> to vector<4xf32>
    %145 = vector.shape_cast %144 : vector<4xf32> to vector<1x4xf32>
    %146 = vector.extract_strided_slice %142 {offsets = [0, 12], sizes = [6, 4], strides = [1, 1]} : vector<7x16xf32> to vector<6x4xf32>
    %cst_98 = arith.constant dense<0xFF800000> : vector<4xf32>
    %147 = vector.multi_reduction <maximumf>, %146, %cst_98 [0] : vector<6x4xf32> to vector<4xf32>
    %148 = vector.shape_cast %147 : vector<4xf32> to vector<1x4xf32>
    %149 = tpu.concatenate %138, %141, %145, %148 in 1 : vector<1x4xf32>, vector<1x4xf32>, vector<1x4xf32>, vector<1x4xf32> -> vector<1x16xf32>
    %150 = tpu.concatenate %134, %149 in 0 : vector<1x16xf32>, vector<1x16xf32> -> vector<2x16xf32>
    %c0_99 = arith.constant 0 : index
    %c0_100 = arith.constant 0 : index
    %151 = vector.load %arg4[%c0_99, %c0_100] : memref<1x16xf32, #tpu.memory_space<vmem>>, vector<1x16xf32>
    %152 = vector.broadcast %151 : vector<1x16xf32> to vector<2x16xf32>
    %153 = arith.addf %150, %152 : vector<2x16xf32>
    %cst_101 = arith.constant 0.000000e+00 : f32
    %154 = vector.broadcast %cst_101 : f32 to vector<2x16xf32>
    %155 = arith.maximumf %153, %154 : vector<2x16xf32>
    %c0_102 = arith.constant 0 : index
    %c0_103 = arith.constant 0 : index
    %156 = vector.load %arg5[%c0_102, %c0_103] : memref<16x8xf32, #tpu.memory_space<vmem>>, vector<16x8xf32>
    %cst_104 = arith.constant dense<0.000000e+00> : vector<2x8xf32>
    %157 = tpu.matmul %155, %156, %cst_104 {dimension_numbers = #tpu.dot_dimension_numbers<[1], [0], [0], [1], [0, 0, 1, 1], [], []>} : vector<2x16xf32>, vector<16x8xf32>, vector<2x8xf32> -> vector<2x8xf32>
    %c0_105 = arith.constant 0 : index
    %c0_106 = arith.constant 0 : index
    %158 = vector.load %arg6[%c0_105, %c0_106] : memref<1x8xf32, #tpu.memory_space<vmem>>, vector<1x8xf32>
    %159 = vector.broadcast %158 : vector<1x8xf32> to vector<2x8xf32>
    %160 = arith.addf %157, %159 : vector<2x8xf32>
    %cst_107 = arith.constant 0.000000e+00 : f32
    %161 = vector.broadcast %cst_107 : f32 to vector<2x8xf32>
    %162 = arith.maximumf %160, %161 : vector<2x8xf32>
    %c0_108 = arith.constant 0 : index
    %c0_109 = arith.constant 0 : index
    %163 = vector.load %arg7[%c0_108, %c0_109] : memref<8x2xf32, #tpu.memory_space<vmem>>, vector<8x2xf32>
    %cst_110 = arith.constant dense<0.000000e+00> : vector<2x2xf32>
    %164 = tpu.matmul %162, %163, %cst_110 {dimension_numbers = #tpu.dot_dimension_numbers<[1], [0], [0], [1], [0, 0, 1, 1], [], []>} : vector<2x8xf32>, vector<8x2xf32>, vector<2x2xf32> -> vector<2x2xf32>
    %c0_111 = arith.constant 0 : index
    %c0_112 = arith.constant 0 : index
    %165 = vector.load %arg8[%c0_111, %c0_112] : memref<1x2xf32, #tpu.memory_space<vmem>>, vector<1x2xf32>
    %166 = vector.broadcast %165 : vector<1x2xf32> to vector<2x2xf32>
    %167 = arith.addf %164, %166 : vector<2x2xf32>
    %c0_113 = arith.constant 0 : index
    %c0_114 = arith.constant 0 : index
    %168 = vector.load %arg9[%c0_113, %c0_114] : memref<2x2xf32, #tpu.memory_space<vmem>>, vector<2x2xf32>
    tpu.vector_store %arg9[%c0_113, %c0_114], %167 {strides = array<i32>} : memref<2x2xf32, #tpu.memory_space<vmem>>, vector<2x2xf32>,
    return
  }
}

</mosaic_0001>

<bundles_post_ra>
// kernel: tpu_custom_call.1
= control target key start
LH: loop header
LB: loop body
LE: loop exit
PB: predicated region body
PF: predicated region fallthrough
CT: control target
= control target key end

     0   :  { %14 = vsyncpa [#allocation4], 0  ;;  %s1257_s0 = inlined_call_operand.vmem [shape: s32[8,2], index: 0, kind: input, shape index: {}]   ;;  %s1258_s1 = inlined_call_operand.vmem [shape: s32[8,2], index: 1, kind: input, shape index: {}]   ;;  %s1259_s2 = inlined_call_operand.vmem [shape: f32[53,16], index: 2, kind: input, shape index: {}]   ;;  %s1260_s3 = inlined_call_operand.vmem [shape: f32[48,16], index: 3, kind: input, shape index: {}]   ;;  %s1261_s4 = inlined_call_operand.vmem [shape: f32[1,16], index: 4, kind: input, shape index: {}]   ;;  %s1262_s5 = inlined_call_operand.vmem [shape: f32[16,8], index: 5, kind: input, shape index: {}]   ;;  %s1263_s6 = inlined_call_operand.vmem [shape: f32[1,8], index: 6, kind: input, shape index: {}]   ;;  %s1264_s7 = inlined_call_operand.vmem [shape: f32[8,2], index: 7, kind: input, shape index: {}]   ;;  %s1265_s8 = inlined_call_operand.vmem [shape: f32[1,2], index: 8, kind: input, shape index: {}]   ;;  %s1266_s9 = inlined_call_operand.hbm [shape: f32[2,2], index: 9, kind: output, shape index: {}]  }
   0x1   :  { %15 = vsyncpa [#allocation6], 0 }
   0x2   :  { %16 = vsyncpa [#allocation3], 0  ;;  %s23_s11 = sshll.u32 %s1257_s0, 4  ;;  %s33_s14 = sshll.u32 %s1258_s1, 4  ;;  %s24_s11 = int_to_ptr.vmem [resolvable:$true] %s23_s11  ;;  %s34_s14 = int_to_ptr.vmem [resolvable:$true] %s33_s14 }
   0x3   :  { %s849_s15 = scalar_lea.vmem %s24_s11, 128  ;;  %p854_p1 = scmp.lt.s32.totalorder %s24_s11, %s24_s11 }
   0x4   :  { %p850_p0 = scmp.ne.s32.totalorder %s24_s11, %s849_s15  ;;  %p855_p2 = scmp.lt.s32.totalorder %s849_s15, %s849_s15 }
   0x6   :  { %p856_p3 = por %p855_p2, %p854_p1 }
   0x8   :  { %p857_p4 = pnand %p856_p3, %p850_p0 }
   0xa   :  { %860 = shalt.err (!%p857_p4)
}
   0xb   :  { %s899_s16 = smov [#allocation2]   ;;  %s861_s17 = scalar_lea.vmem %s34_s14, 128 }
   0xc   :  { %26 = dma.vmem_to_smem %s24_s11, 128, %s899_s16, [#allocation4]  }
   0xd   :  { %p862_p5 = scmp.ne.s32.totalorder %s34_s14, %s861_s17  ;;  %p866_p6 = scmp.lt.s32.totalorder %s34_s14, %s34_s14 }
   0xe   :  { %p867_p7 = scmp.lt.s32.totalorder %s861_s17, %s861_s17 }
  0x10   :  { %p868_p8 = por %p867_p7, %p866_p6 }
  0x12   :  { %p869_p9 = pnand %p868_p8, %p862_p5 }
  0x14   :  { %872 = shalt.err (!%p869_p9)
}
  0x15   :  { %s900_s0 = smov [#allocation5]  }
  0x16   :  { %36 = dma.vmem_to_smem %s34_s14, 128, %s900_s0, [#allocation6]  }
  0x17   :  { %893 = dma.done.wait [#allocation4], 128  }
  0x18   :  { %894 = vsyncadd [#allocation4], 4294967168 }
  0x19   :  { %895 = dma.done.wait [#allocation6], 128  }
  0x1a   :  { %896 = vsyncadd [#allocation6], 4294967168 }
  0x1b   :  { %57 = sfence }
  0x1c   :  { %s197_s1 = sld [smem:[#allocation5]]  ;;  %v901_v0 = vmov 0.0   ;;  %vm103_vm0 = vcmask 1040384   ;;  %vm105_vm1 = vcmask 1041408   ;;  %vm107_vm2 = vcmask 1042432   ;;  %v342_v22 = vld [vmem:[%s1260_s3 + $0x28] sm:$0xff] }
  0x1d   :  { %s773_s18 = sld [smem:[#allocation5 + $0x80]]  ;;  %830 = vmatprep.subr.mxu1 %v901_v0  ;;  %vm109_vm3 = vcmask 1043456   ;;  %vm111_vm4 = vcmask 1044480   ;;  %vm113_vm5 = vcmask 1045504   ;;  %vm115_vm6 = vcmask 1046528   ;;  %812 = vmatprep.subr.mxu0 %v342_v22  ;;  %v341_v25 = vld [vmem:[%s1260_s3 + $0x20] sm:$0xff] }
  0x1e   :  { %s774_s19 = sld [smem:[#allocation5 + $0x100]]  ;;  %813 = vmatpush3.msra.mxu0 %v342_v22  ;;  %s902_s23 = smov 16   ;;  %v340_v47 = vld [vmem:[%s1260_s3 + $0x18] sm:$0xff]  ;;  %v339_v50 = vld [vmem:[%s1260_s3 + $0x10] sm:$0xff]  ;;  %v1098_v52 = vrot.slane %v901_v0, 2  ;;  %v338_v60 = vld [vmem:[%s1260_s3 + $0x8] sm:$0xff] }
  0x1f   :  { %s775_s20 = sld [smem:[#allocation5 + $0x180]]  ;;  %814 = vmatprep.subr.mxu0 %v341_v25  ;;  %v337_v63 = vld [vmem:[%s1260_s3] sm:$0xff]  ;;  %vm129_vm7 = vcmask 130048   ;;  %vm131_vm8 = vcmask 261120   ;;  %vm343_vm9 = vcmask 392192   ;;  %vm904_vm10 = vmmov 0  }
  0x20   :  { %s776_s21 = sld [smem:[#allocation5 + $0x200]]  ;;  %815 = vmatpush3.msra.mxu0 %v341_v25  ;;  %834 = vmatprep.mubr.msk.f32.mxu1 %vm904_vm10, %v901_v0  ;;  %vm486_vm11 = vcmask 29696   ;;  %vm497_vm12 = vcmask 61472   ;;  %vm440_vm13 = vcmask 30720   ;;  %vm448_vm14 = vcmask 62496   ;;  %s905_s24 = smov [#allocation7]  }
  0x21   :  { %s777_s22 = sld [smem:[#allocation5 + $0x280]]  ;;  %816 = vmatprep.subr.mxu0 %v340_v47  ;;  %vm484_vm15 = vcmask 31751  }
  0x22   :  { %s198_s25 = scalar_lea.vmem %s1259_s2, %s197_s1  ;;  %s966_s26 = sld [smem:[#allocation5 + $0x300]]  ;;  %817 = vmatpush3.msra.mxu0 %v340_v47 }
  0x23   :  { %s201_s29 = scalar_lea.vmem %s1259_s2, %s773_s18  ;;  %s971_s30 = sld [smem:[#allocation5 + $0x380]]  ;;  %v199_v1 = vld [vmem:[%s198_s25] sm:$0x1]  ;;  %818 = vmatprep.subr.mxu0 %v339_v50 }
  0x24   :  { %v202_v2 = vld [vmem:[%s201_s29] sm:$0x1]  ;;  %s204_s12 = scalar_lea.vmem %s1259_s2, %s774_s19  ;;  %s976_s13 = sld [smem:[#allocation2 + $0x1]]  ;;  %819 = vmatpush3.msra.mxu0 %v339_v50 }
  0x25   :  { %v205_v3 = vld [vmem:[%s204_s12] sm:$0x1]  ;;  %s207_s16 = scalar_lea.vmem %s1259_s2, %s775_s20  ;;  %v222_v4 = vrot.slane %v202_v2, 7  ;;  %s981_s17 = sld [smem:[#allocation2 + $0x81]]  ;;  %820 = vmatprep.subr.mxu0 %v338_v60 }
  0x26   :  { %v208_v5 = vld [vmem:[%s207_s16] sm:$0x1]  ;;  %s210_s18 = scalar_lea.vmem %s1259_s2, %s776_s21  ;;  %v225_v6 = vrot.slane %v205_v3, 6  ;;  %s986_s19 = sld [smem:[#allocation2 + $0x101]]  ;;  %821 = vmatpush3.msra.mxu0 %v338_v60 }
  0x27   :  { %v211_v7 = vld [vmem:[%s210_s18] sm:$0x1]  ;;  %s213_s20 = scalar_lea.vmem %s1259_s2, %s777_s22  ;;  %v228_v8 = vrot.slane %v208_v5, 5  ;;  %v242_v9 = vsel %vm103_vm0, %v199_v1, %v222_v4  ;;  %s992_s25 = sld [smem:[#allocation2 + $0x181]]  ;;  %822 = vmatprep.subr.mxu0 %v337_v63 }
  0x28   :  { %v214_v10 = vld [vmem:[%s213_s20] sm:$0x1]  ;;  %s216_s28 = scalar_lea.vmem %s1259_s2, %s966_s26  ;;  %v231_v11 = vrot.slane %v211_v7, 4  ;;  %v243_v12 = vsel %vm105_vm1, %v242_v9, %v225_v6  ;;  %s999_s29 = sld [smem:[#allocation2 + $0x201]]  ;;  %823 = vmatpush3.msra.mxu0 %v337_v63 }
  0x29   :  { %v217_v13 = vld [vmem:[%s216_s28] sm:$0x1]  ;;  %s219_s11 = scalar_lea.vmem %s1259_s2, %s971_s30  ;;  %v234_v14 = vrot.slane %v214_v10, 3  ;;  %v244_v15 = vsel %vm107_vm2, %v243_v12, %v228_v8  ;;  %s1006_s12 = sld [smem:[#allocation2 + $0x281]] }
  0x2a   :  { %v220_v16 = vld [vmem:[%s219_s11] sm:$0x1]  ;;  %v237_v17 = vrot.slane %v217_v13, 2  ;;  %v245_v18 = vsel %vm109_vm3, %v244_v15, %v231_v11  ;;  %s134_s15 = scalar_lea.vmem %s1259_s2, %s976_s13  ;;  %s1013_s16 = sld [smem:[#allocation2 + $0x301]] }
  0x2b   :  { %v240_v19 = vrot.slane %v220_v16, 1  ;;  %v246_v20 = vsel %vm111_vm4, %v245_v18, %v234_v14  ;;  %v135_v21 = vld [vmem:[%s134_s15] sm:$0x1]  ;;  %s137_s1 = scalar_lea.vmem %s1259_s2, %s981_s17  ;;  %s1020_s18 = sld [smem:[#allocation2 + $0x381]] }
  0x2c   :  { %v247_v23 = vsel %vm113_vm5, %v246_v20, %v237_v17  ;;  %v138_v24 = vld [vmem:[%s137_s1] sm:$0x1]  ;;  %s140_s27 = scalar_lea.vmem %s1259_s2, %s986_s19  ;;  %s1030_s21 = sld [smem:[#allocation2]] }
  0x2d   :  { %v1036_v26 = vsel %vm115_vm6, %v247_v23, %v240_v19  ;;  %v141_v27 = vld [vmem:[%s140_s27] sm:$0x1]  ;;  %s143_s11 = scalar_lea.vmem %s1259_s2, %s992_s25  ;;  %v158_v28 = vrot.slane %v138_v24, 7  ;;  %s1042_s26 = sld [smem:[#allocation2 + $0x80]] }
  0x2e   :  { %v250_v29 = vrot.slane %v1036_v26, 1  ;;  %v144_v30 = vld [vmem:[%s143_s11] sm:$0x1]  ;;  %s146_s15 = scalar_lea.vmem %s1259_s2, %s999_s29  ;;  %v161_v31 = vrot.slane %v141_v27, 6  ;;  %s1054_s1 = sld [smem:[#allocation2 + $0x100]]  ;;  %v254_v1 = vrot.slane %v1036_v26, 2 }
  0x2f   :  { %v147_v32 = vld [vmem:[%s146_s15] sm:$0x1]  ;;  %s149_s25 = scalar_lea.vmem %s1259_s2, %s1006_s12  ;;  %v164_v33 = vrot.slane %v144_v30, 5  ;;  %v178_v34 = vsel %vm103_vm0, %v135_v21, %v158_v28  ;;  %s1062_s12 = sld [smem:[#allocation2 + $0x180]] }
  0x30   :  { %251 = vrot.lane.b32.xlu1 %v250_v29, %s902_s23  ;;  %v150_v35 = vld [vmem:[%s149_s25] sm:$0x1]  ;;  %s152_s13 = scalar_lea.vmem %s1259_s2, %s1013_s16  ;;  %v167_v36 = vrot.slane %v147_v32, 4  ;;  %v179_v37 = vsel %vm105_vm1, %v178_v34, %v161_v31  ;;  %s1069_s17 = sld [smem:[#allocation2 + $0x200]]  ;;  %v255_v15 = vsel %vm113_vm5, %v254_v1, %v1098_v52 }
  0x31   :  { %v153_v38 = vld [vmem:[%s152_s13] sm:$0x1]  ;;  %s155_s28 = scalar_lea.vmem %s1259_s2, %s1020_s18  ;;  %v170_v39 = vrot.slane %v150_v35, 3  ;;  %v180_v40 = vsel %vm107_vm2, %v179_v37, %v164_v33  ;;  %s1076_s11 = sld [smem:[#allocation2 + $0x280]] }
  0x32   :  { %v156_v41 = vld [vmem:[%s155_s28] sm:$0x1]  ;;  %v173_v42 = vrot.slane %v153_v38, 2  ;;  %v181_v43 = vsel %vm109_vm3, %v180_v40, %v167_v36  ;;  %s59_s10 = scalar_lea.vmem %s1259_s2, %s1030_s21  ;;  %s1083_s15 = sld [smem:[#allocation2 + $0x300]] }
  0x33   :  { %v176_v44 = vrot.slane %v156_v41, 1  ;;  %v182_v45 = vsel %vm111_vm4, %v181_v43, %v170_v39  ;;  %v60_v46 = vld [vmem:[%s59_s10] sm:$0x1]  ;;  %s62_s14 = scalar_lea.vmem %s1259_s2, %s1042_s26  ;;  %s1089_s21 = sld [smem:[#allocation2 + $0x380]] }
  0x34   :  { %v183_v48 = vsel %vm113_vm5, %v182_v45, %v173_v42  ;;  %v63_v49 = vld [vmem:[%s62_s14] sm:$0x1]  ;;  %s65_s13 = scalar_lea.vmem %s1259_s2, %s1054_s1  ;;  %s1104_s20 = sld [smem:[#allocation5 + $0x1]] }
  0x35   :  { %v1095_v51 = vsel %vm115_vm6, %v183_v48, %v176_v44  ;;  %v83_v53 = vrot.slane %v63_v49, 7  ;;  %v66_v56 = vld [vmem:[%s65_s13] sm:$0x1]  ;;  %s68_s16 = scalar_lea.vmem %s1259_s2, %s1062_s12  ;;  %s1112_s22 = sld [smem:[#allocation5 + $0x81]] }
  0x36   :  { %v186_v54 = vrot.slane %v1095_v51, 1  ;;  %v190_v55 = vrot.slane %v1095_v51, 2  ;;  %v69_v57 = vld [vmem:[%s68_s16] sm:$0x1]  ;;  %s71_s18 = scalar_lea.vmem %s1259_s2, %s1069_s17  ;;  %v86_v58 = vrot.slane %v66_v56, 6  ;;  %s1119_s19 = sld [smem:[#allocation5 + $0x101]] }
  0x37   :  { %v104_v59 = vsel %vm103_vm0, %v60_v46, %v83_v53  ;;  %v72_v61 = vld [vmem:[%s71_s18] sm:$0x1]  ;;  %s74_s25 = scalar_lea.vmem %s1259_s2, %s1076_s11  ;;  %v89_v62 = vrot.slane %v69_v57, 5  ;;  %s1129_s17 = sld [smem:[#allocation5 + $0x181]] }
  0x38   :  { %187 = vrot.lane.b32.xlu0 %v186_v54, %s902_s23  ;;  %v191_v2 = vsel %vm113_vm5, %v190_v55, %v1098_v52  ;;  %v75_v3 = vld [vmem:[%s74_s25] sm:$0x1]  ;;  %s77_s27 = scalar_lea.vmem %s1259_s2, %s1083_s15  ;;  %v92_v4 = vrot.slane %v72_v61, 4  ;;  %v106_v5 = vsel %vm105_vm1, %v104_v59, %v86_v58  ;;  %s1142_s11 = sld [smem:[#allocation5 + $0x201]] }
  0x39   :  { %v78_v6 = vld [vmem:[%s77_s27] sm:$0x1]  ;;  %s80_s16 = scalar_lea.vmem %s1259_s2, %s1089_s21  ;;  %v95_v7 = vrot.slane %v75_v3, 3  ;;  %v108_v8 = vsel %vm107_vm2, %v106_v5, %v89_v62  ;;  %s1149_s10 = sld [smem:[#allocation5 + $0x281]] }
  0x3a   :  { %v81_v9 = vld [vmem:[%s80_s16] sm:$0x1]  ;;  %v98_v10 = vrot.slane %v78_v6, 2  ;;  %v110_v11 = vsel %vm109_vm3, %v108_v8, %v92_v4  ;;  %s262_s18 = scalar_lea.vmem %s1259_s2, %s1104_s20  ;;  %s1156_s14 = sld [smem:[#allocation5 + $0x301]]  ;;  %v545_v4 = vld [vmem:[%s1262_s5 + $0x8] sm:$0xff] }
  0x3b   :  { %s903_s21 = smov 32   ;;  %v101_v12 = vrot.slane %v81_v9, 1  ;;  %v112_v13 = vsel %vm111_vm4, %v110_v11, %v95_v7  ;;  %s265_s0 = scalar_lea.vmem %s1259_s2, %s1112_s22  ;;  %v263_v16 = vld [vmem:[%s262_s18] sm:$0x1]  ;;  %831 = vmatpush3.msra.mxu1 %v545_v4 }
  0x3c   :  { %192 = vrot.lane.b32.xlu0 %v191_v2, %s903_s21  ;;  %s1164_s25 = sld [smem:[#allocation5 + $0x381]]  ;;  %v114_v14 = vsel %vm113_vm5, %v112_v13, %v98_v10  ;;  %v266_v17 = vld [vmem:[%s265_s0] sm:$0x1]  ;;  %s268_s26 = scalar_lea.vmem %s1259_s2, %s1119_s19  ;;  %832 = vmatprep.subr.mxu1 %v901_v0 }
  0x3d   :  { %v116_v18 = vsel %vm115_vm6, %v114_v14, %v101_v12  ;;  %v269_v19 = vld [vmem:[%s268_s26] sm:$0x1]  ;;  %s271_s13 = scalar_lea.vmem %s1259_s2, %s1129_s17  ;;  %v286_v20 = vrot.slane %v266_v17, 7  ;;  %s716_s22 = sshll.u32 %s905_s24, 4  ;;  %s717_s22 = int_to_ptr.vmem [resolvable:$true] %s716_s22 }
  0x3e   :  { %v118_v21 = vrot.slane %v116_v18, 1  ;;  %v123_v22 = vrot.slane %v116_v18, 2  ;;  %v272_v23 = vld [vmem:[%s271_s13] sm:$0x1]  ;;  %s274_s3 = scalar_lea.vmem %s1259_s2, %s1142_s11  ;;  %v289_v24 = vrot.slane %v269_v19, 6  ;;  %p878_p11 = scmp.lt.s32.totalorder %s717_s22, %s717_s22 }
  0x3f   :  { %v275_v25 = vld [vmem:[%s274_s3] sm:$0x1]  ;;  %s277_s15 = scalar_lea.vmem %s1259_s2, %s1149_s10  ;;  %v292_v27 = vrot.slane %v272_v23, 5  ;;  %v306_v28 = vsel %vm103_vm0, %v263_v16, %v286_v20 }
  0x40   :  { %256 = vrot.lane.b32.xlu0 %v255_v15, %s903_s21  ;;  %119 = vrot.lane.b32.xlu1 %v118_v21, %s902_s23  ;;  %v278_v29 = vld [vmem:[%s277_s15] sm:$0x1]  ;;  %s280_s18 = scalar_lea.vmem %s1259_s2, %s1156_s14  ;;  %v295_v30 = vrot.slane %v275_v25, 4  ;;  %v307_v31 = vsel %vm105_vm1, %v306_v28, %v289_v24  ;;  %v125_v32 = vsel %vm113_vm5, %v123_v22, %v1098_v52  ;;  %vm495_vm1 = vcmask 64551  }
  0x41   :  { %v281_v33 = vld [vmem:[%s280_s18] sm:$0x1]  ;;  %v298_v34 = vrot.slane %v278_v29, 3  ;;  %v308_v35 = vsel %vm107_vm2, %v307_v31, %v292_v27  ;;  %vm458_vm2 = vcmask 94272  }
  0x42   :  { %s283_s10 = scalar_lea.vmem %s1259_s2, %s1164_s25  ;;  %v301_v37 = vrot.slane %v281_v33, 2  ;;  %v309_v38 = vsel %vm109_vm3, %v308_v35, %v295_v30  ;;  %v544_v5 = vld [vmem:[%s1262_s5] sm:$0xff]  ;;  %vm469_vm3 = vcmask 126048  }
  0x43   :  { %v284_v36 = vld [vmem:[%s283_s10] sm:$0x1]  ;;  %v310_v40 = vsel %vm111_vm4, %v309_v38, %v298_v34  ;;  %833 = vmatpush3.msra.mxu1 %v544_v5 }
  0x44   :  { %v304_v39 = vrot.slane %v284_v36, 1  ;;  %126 = vrot.lane.b32.xlu1 %v125_v32, %s903_s21  ;;  %v311_v41 = vsel %vm113_vm5, %v310_v40, %v301_v37  ;;  %837 = vmatprep.subr.mxu1 %v901_v0 }
  0x46   :  { %v312_v42 = vsel %vm115_vm6, %v311_v41, %v304_v39 }
  0x47   :  { %v314_v43 = vrot.slane %v312_v42, 1  ;;  %v318_v44 = vrot.slane %v312_v42, 2 }
  0x49   :  { %315 = vrot.lane.b32.xlu0 %v314_v43, %s902_s23  ;;  %v319_v45 = vsel %vm113_vm5, %v318_v44, %v1098_v52 }
  0x4a   :  { %320 = vrot.lane.b32.xlu1 %v319_v45, %s903_s21 }
  0xa2   :  { %v252_v47 = vpop.permute.xlu1 %251 }
  0xa3   :  { %v259_v49 = vsel %vm129_vm7, %v1036_v26, %v252_v47 }
  0xaa   :  { %v188_v46 = vpop.permute.xlu0 %187 }
  0xab   :  { %v195_v50 = vsel %vm129_vm7, %v1095_v51, %v188_v46 }
  0xae   :  { %v193_v48 = vpop.permute.xlu0 %192 }
  0xaf   :  { %v196_v54 = vsel %vm131_vm8, %v195_v50, %v193_v48 }
  0xb0   :  { %v326_v57 = vrot.slane %v196_v54, 1 }
  0xb2   :  { %v257_v53 = vpop.permute.xlu0 %256  ;;  %v120_v55 = vpop.permute.xlu1 %119 }
  0xb3   :  { %v260_v56 = vsel %vm131_vm8, %v259_v49, %v257_v53  ;;  %v130_v58 = vsel %vm129_vm7, %v116_v18, %v120_v55 }
  0xb4   :  { %v329_v52 = vrot.slane %v260_v56, 2 }
  0xb6   :  { %v127_v59 = vpop.permute.xlu1 %126  ;;  %v335_v61 = vsel %vm113_vm5, %v326_v57, %v329_v52  ;;  %vm517_vm5 = vcmask 130149  }
  0xb7   :  { %v132_v60 = vsel %vm131_vm8, %v130_v58, %v127_v59 }
  0xb8   :  { %v334_v26 = vsel %vm115_vm6, %v132_v60, %v326_v57  ;;  %vm508_vm6 = vcmask 93248  }
  0xb9   :  { %824 = vmatprep.mubr.msk.f32.mxu0 %vm343_vm9, %v334_v26 }
  0xba   :  { %825 = vmatmul.mubr.msk.f32.vlgmr.msra.gmra.mxu0 %vm343_vm9, %v335_v61 }
  0xbb   :  { %v316_v51 = vpop.permute.xlu0 %315 }
  0xbc   :  { %v323_v62 = vsel %vm129_vm7, %v312_v42, %v316_v51  ;;  %v321_v63 = vpop.permute.xlu1 %320 }
  0xbd   :  { %v324_v1 = vsel %vm131_vm8, %v323_v62, %v321_v63  ;;  %vm519_vm8 = vcmask 125024  }
  0xbe   :  { %v332_v2 = vrot.slane %v324_v1, 3 }
  0xc0   :  { %v336_v3 = vsel %vm111_vm4, %v329_v52, %v332_v2  ;;  %vm506_vm4 = vcmask 97349  }
  0xc1   :  { %827 = vmatprep.mubr.msk.f32.mxu0 %vm343_vm9, %v336_v3 }
  0xc2   :  { %828 = vmatmul.mubr.msk.f32.gmra.mxu0 %vm343_vm9, %v332_v2  ;;  %vm456_vm9 = vcmask 97350  }
 0x17a   :  { %v826_v6 = vpop.f32.mrf.mxu0 }
 0x17b   :  { %v487_v7 = vsel %vm486_vm11, %v826_v6, -inf  ;;  %v498_v8 = vsel %vm497_vm12, %v826_v6, -inf  ;;  %vm467_vm11 = vcmask 130150   ;;  %v457_v37 = vsel %vm456_vm9, %v826_v6, -inf }
 0x17c   :  { %v421_v9 = vpop.f32.mrf.mxu0  ;;  %v468_v38 = vsel %vm467_vm11, %v826_v6, -inf  ;;  %vm478_vm12 = vcmask 31744  }
 0x17d   :  { %v441_v10 = vsel %vm440_vm13, %v421_v9, -inf  ;;  %v449_v11 = vsel %vm448_vm14, %v421_v9, -inf  ;;  %v485_v12 = vsel %vm484_vm15, %v421_v9, -inf  ;;  %v496_v13 = vsel %vm495_vm1, %v421_v9, -inf }
 0x17e   :  { %v442_v14 = vrot.slane %v441_v10, 4  ;;  %v450_v15 = vrot.slane %v449_v11, 4  ;;  %v488_v16 = vmax.f32 %v485_v12, %v487_v7  ;;  %v499_v17 = vmax.f32 %v496_v13, %v498_v8 }
 0x17f   :  { %vm480_vm13 = vcmask 64512   ;;  %vm482_vm14 = vcmask 97280  }
 0x180   :  { %v443_v18 = vmax.f32 %v441_v10, %v442_v14  ;;  %v451_v19 = vmax.f32 %v449_v11, %v450_v15  ;;  %v489_v20 = vrot.slane %v488_v16, 4  ;;  %v500_v21 = vrot.slane %v499_v17, 4 }
 0x182   :  { %v829_v22 = vpop.f32.mrf.mxu0  ;;  %v490_v23 = vmax.f32 %v488_v16, %v489_v20  ;;  %v501_v24 = vmax.f32 %v499_v17, %v500_v21  ;;  %v444_v27 = vrot.slane %v443_v18, 2  ;;  %v452_v28 = vrot.slane %v451_v19, 2  ;;  %v792_v21 = vld [vmem:[%s1261_s4] ss:$0 sm:$0xff] }
 0x183   :  { %v509_v35 = vsel %vm508_vm6, %v829_v22, -inf  ;;  %v520_v36 = vsel %vm519_vm8, %v829_v22, -inf }
 0x184   :  { %v431_v25 = vpop.f32.mrf.mxu0  ;;  %v491_v29 = vrot.slane %v490_v23, 2  ;;  %v502_v30 = vrot.slane %v501_v24, 2  ;;  %v445_v43 = vmax.f32 %v443_v18, %v444_v27  ;;  %v453_v44 = vmax.f32 %v451_v19, %v452_v28  ;;  %v627_v27 = vld [vmem:[%s1264_s7] sm:$0xff]  ;;  %s873_s7 = scalar_lea.vmem %s717_s22, 32 }
 0x185   :  { %v459_v31 = vsel %vm458_vm2, %v431_v25, -inf  ;;  %v470_v32 = vsel %vm469_vm3, %v431_v25, -inf  ;;  %v507_v33 = vsel %vm506_vm4, %v431_v25, -inf  ;;  %v518_v34 = vsel %vm517_vm5, %v431_v25, -inf  ;;  %v793_v28 = vld [vmem:[%s1263_s6] ss:$0 sm:$0xff]  ;;  %p874_p10 = scmp.ne.s32.totalorder %s717_s22, %s873_s7  ;;  %p879_p12 = scmp.lt.s32.totalorder %s873_s7, %s873_s7 }
 0x186   :  { %v460_v39 = vmax.f32 %v457_v37, %v459_v31  ;;  %v471_v40 = vmax.f32 %v468_v38, %v470_v32  ;;  %v510_v41 = vmax.f32 %v507_v33, %v509_v35  ;;  %v521_v42 = vmax.f32 %v518_v34, %v520_v36  ;;  %v795_v33 = vld [vmem:[%s1265_s8] ss:$0 sm:$0xff] }
 0x187   :  { %v492_v45 = vmax.f32 %v490_v23, %v491_v29  ;;  %v503_v46 = vmax.f32 %v501_v24, %v502_v30  ;;  %v446_v52 = vrot.slane %v445_v43, 1  ;;  %v454_v57 = vrot.slane %v453_v44, 1  ;;  %p880_p13 = por %p879_p12, %p878_p11 }
 0x188   :  { %v461_v47 = vrot.slane %v460_v39, 4  ;;  %v472_v48 = vrot.slane %v471_v40, 4  ;;  %v511_v49 = vrot.slane %v510_v41, 4  ;;  %v522_v50 = vrot.slane %v521_v42, 4 }
 0x189   :  { %v493_v58 = vrot.slane %v492_v45, 1  ;;  %v504_v59 = vrot.slane %v503_v46, 1  ;;  %v447_v3 = vmax.f32 %v445_v43, %v446_v52  ;;  %v455_v4 = vmax.f32 %v453_v44, %v454_v57  ;;  %p881_p0 = pnand %p880_p13, %p874_p10 }
 0x18a   :  { %v462_v53 = vmax.f32 %v460_v39, %v461_v47  ;;  %v473_v54 = vmax.f32 %v471_v40, %v472_v48  ;;  %v512_v55 = vmax.f32 %v510_v41, %v511_v49  ;;  %v523_v56 = vmax.f32 %v521_v42, %v522_v50 }
 0x18b   :  { %v494_v5 = vmax.f32 %v492_v45, %v493_v58  ;;  %v505_v6 = vmax.f32 %v503_v46, %v504_v59  ;;  %v479_v14 = vsel %vm478_vm12, %v447_v3, %v455_v4 }
 0x18c   :  { %v463_v60 = vrot.slane %v462_v53, 2  ;;  %v474_v61 = vrot.slane %v473_v54, 2  ;;  %v513_v26 = vrot.slane %v512_v55, 2  ;;  %v524_v51 = vrot.slane %v523_v56, 2 }
 0x18d   :  { %v528_v16 = vsel %vm478_vm12, %v494_v5, %v505_v6 }
 0x18e   :  { %v464_v62 = vmax.f32 %v462_v53, %v463_v60  ;;  %v475_v63 = vmax.f32 %v473_v54, %v474_v61  ;;  %v514_v1 = vmax.f32 %v512_v55, %v513_v26  ;;  %v525_v2 = vmax.f32 %v523_v56, %v524_v51 }
 0x190   :  { %v465_v7 = vrot.slane %v464_v62, 1  ;;  %v476_v8 = vrot.slane %v475_v63, 1  ;;  %v515_v9 = vrot.slane %v514_v1, 1  ;;  %v526_v10 = vrot.slane %v525_v2, 1 }
 0x192   :  { %v466_v11 = vmax.f32 %v464_v62, %v465_v7  ;;  %v516_v12 = vmax.f32 %v514_v1, %v515_v9  ;;  %v527_v13 = vmax.f32 %v525_v2, %v526_v10  ;;  %v477_v15 = vmax.f32 %v475_v63, %v476_v8 }
 0x194   :  { %v529_v17 = vsel %vm480_vm13, %v528_v16, %v516_v12  ;;  %v481_v18 = vsel %vm480_vm13, %v479_v14, %v466_v11 }
 0x195   :  { %v530_v19 = vsel %vm482_vm14, %v529_v17, %v527_v13  ;;  %v483_v22 = vsel %vm482_vm14, %v481_v18, %v477_v15 }
 0x196   :  { %v532_v20 = vrot.slane %v530_v19, 7 }
 0x198   :  { %v534_v23 = vsel %vm103_vm0, %v483_v22, %v532_v20  ;;  %vm708_vm0 = vcmask 9216  }
 0x199   :  { %v542_v24 = vadd.f32 %v792_v21, %v534_v23 }
 0x19b   :  { %v543_v25 = vmax.f32 %v542_v24, 0.0 }
 0x19d   :  { %835 = vmatmul.mubr.msk.f32.vlgmr.msra.gmra.mxu1 %vm129_vm7, %v543_v25 }
 0x19e   :  { %839 = vmatprep.mubr.msk.f32.mxu1 %vm904_vm10, %v901_v0  ;;  %838 = vmatpush3.msra.mxu1 %v627_v27 }
 0x25d   :  { %v622_v29 = vpop.f32.mrf.mxu1 }
 0x25e   :  { %v623_v30 = vadd.f32 %v793_v28, %v622_v29 }
 0x25f   :  { %v836_v31 = vpop.f32.mrf.mxu1 }
 0x260   :  { %v626_v32 = vmax.f32 %v623_v30, 0.0 }
 0x262   :  { %840 = vmatmul.mubr.msk.f32.vlgmr.msra.gmra.mxu1 %vm480_vm13, %v626_v32 }
 0x322   :  { %v704_v0 = vpop.f32.mrf.mxu1 }
 0x323   :  { %v705_v34 = vadd.f32 %v795_v33, %v704_v0 }
 0x324   :  { %v841_v35 = vpop.f32.mrf.mxu1 }
 0x325   :  { %709 = vst.msk [vmem:[#allocation7] sm:$0x3] %vm708_vm0, %v705_v34 }
 0x326   :  { %884 = shalt.err (!%p881_p0)
}
 0x327   :  { %719 = dma.vmem_to_hbm [thread:$0]  %s717_s22, 32, %s1266_s9, [#allocation3]  }
 0x328   :  { %897 = dma.done.wait [#allocation3], 32  }
 0x329   :  { %898 = vsyncadd [#allocation3], 4294967264 }
 0x32a   :  { %723 = vsyncpa [#allocation3], 1 }
 0x32b   :  { %724 = vsyncpa [#allocation4], 1 }
 0x32c   :  { %725 = vsyncpa [#allocation6], 1 }

</bundles_post_ra>
